<compile_context>
chip_gen: v7x
topology: tpu7x:2x2x1
jax: 0.10.0
libtpu: 0.0.40
codegen_flags: <defaults>
</compile_context>

<pallas_src>
import jax
import jax.numpy as jnp
from jax import lax
from jax.experimental import pallas as pl
from jax.experimental.pallas import tpu as pltpu


# ---------------------------------------------------------------------------
# Projection kernel: out = x @ W + b  (bf16 MXU operands, f32 accumulate)
# ---------------------------------------------------------------------------
def _linear_kernel(x_ref, w_ref, b_ref, o_ref):
    """x_ref: (ts, Din) bf16, w_ref: (Din, Dout) bf16, b_ref: (1, Dout) f32,
    o_ref: (ts, Dout) bf16."""
    acc = jnp.dot(x_ref[...], w_ref[...], preferred_element_type=jnp.float32)
    o_ref[...] = (acc + b_ref[...]).astype(o_ref.dtype)


def _project(x_bf16, w_bf16, b_f32, *, ts_cap=512):
    """(B, S, Din) bf16 @ (Din, Dout) bf16 + (1, Dout) f32 -> (B, S, Dout) bf16."""
    B, S, Din = x_bf16.shape
    Dout = w_bf16.shape[1]
    ts = _pick_tile(S, ts_cap)
    grid = (B, S // ts)
    # TODO(synk): weights/bias have constant index maps; a Buffered(1) pipeline
    # mode would save one buffer of VMEM on v7x (negligible at these dims).
    return pl.pallas_call(
        _linear_kernel,
        out_shape=jax.ShapeDtypeStruct((B, S, Dout), jnp.bfloat16),
        grid=grid,
        in_specs=[
            pl.BlockSpec((None, ts, Din), lambda b, si: (b, si, 0)),
            pl.BlockSpec((Din, Dout), lambda b, si: (0, 0)),
            pl.BlockSpec((1, Dout), lambda b, si: (0, 0)),
        ],
        out_specs=pl.BlockSpec((None, ts, Dout), lambda b, si: (b, si, 0)),
        compiler_params=pltpu.CompilerParams(
            dimension_semantics=("parallel", "parallel")),
    )(x_bf16, w_bf16, b_f32)


# ---------------------------------------------------------------------------
# Flash-attention kernel on pre-projected, pre-scaled q / k / v tiles
# ---------------------------------------------------------------------------
def _flash_attn_kernel(q_ref, k_ref, v_ref, o_ref, m_sc, l_sc, acc_sc):
    """Grid = (B, Sq//tq, Sk//tk); batch dim squeezed out of the refs.

    q_ref : (tq, Dkp) bf16 (already scaled by 1/sqrt(dk))
    k_ref : (tk, Dkp) bf16      v_ref : (tk, Dvp) bf16
    o_ref : (tq, Dvp)
    scratch: m_sc/l_sc (tq, 1) f32, acc_sc (tq, Dvp) f32
    """
    ki = pl.program_id(2)

    @pl.when(ki == 0)
    def _():
        # Note: -inf init is fine here (no masking); a masked variant would need
        # a safe init to avoid (-inf) - (-inf) = NaN on fully-masked rows.
        m_sc[...] = jnp.full_like(m_sc, -jnp.inf)
        l_sc[...] = jnp.zeros_like(l_sc)
        acc_sc[...] = jnp.zeros_like(acc_sc)

    # scores = q @ k^T without materializing k.T: contract the last dims directly.
    scores = lax.dot_general(q_ref[...], k_ref[...], (((1,), (1,)), ((), ())),
                             preferred_element_type=jnp.float32)

    # Online (flash) softmax; statistics strictly in f32.
    m_prev = m_sc[...]
    m_new = jnp.maximum(m_prev, jnp.max(scores, axis=-1, keepdims=True))
    alpha = jnp.exp(m_prev - m_new)
    p = jnp.exp(scores - m_new)
    l_sc[...] = alpha * l_sc[...] + jnp.sum(p, axis=-1, keepdims=True)
    acc_sc[...] = alpha * acc_sc[...] + jnp.dot(p.astype(jnp.bfloat16), v_ref[...],
                                                preferred_element_type=jnp.float32)
    m_sc[...] = m_new

    @pl.when(ki == pl.num_programs(2) - 1)
    def _():
        # Exact divide: runs once per q-tile on a (tq, Dvp) tile, essentially free.
        o_ref[...] = (acc_sc[...] / l_sc[...]).astype(o_ref.dtype)


# ---------------------------------------------------------------------------
# Tiling helpers
# ---------------------------------------------------------------------------
def _round_up(x, m):
    return ((x + m - 1) // m) * m


def _pad_cols(a, n):
    pad = n - a.shape[-1]
    if pad == 0:
        return a
    return jnp.pad(a, [(0, 0)] * (a.ndim - 1) + [(0, pad)])


def _pick_tile(s, cap):
    """Largest multiple-of-8 divisor of s that is <= cap (or s itself if s <= cap)."""
    if s <= cap:
        return s
    for t in range(min(cap, s), 0, -1):
        if s % t == 0 and t % 8 == 0:
            return t
    # TODO(synk): pad + mask awkward (prime/odd) sequence lengths instead of
    # falling back to the full sequence.
    return s


def _attn_vmem_bytes(tq, tk, dkp, dvp, out_bytes):
    """Rough double-buffered VMEM estimate for the attention kernel."""
    bf, dbl = 2, 2
    q = dbl * tq * dkp * bf
    k = dbl * tk * dkp * bf
    v = dbl * tk * dvp * bf
    o = dbl * tq * dvp * out_bytes
    scratch = tq * dvp * 4 + 2 * tq * 128 * 4        # acc + (m, l) padded to lanes
    interm = 3 * tq * tk * 4                          # scores / p / alpha-scaled temps
    return q + k + v + o + scratch + interm


def _attention_tiles(Sq, Sk, dkp, dvp, out_bytes, tq_cap, tk_cap, budget):
    """VMEM-aware tile pick; shrinks tk before tq (tq amortizes K/V re-streaming)."""
    tq_c, tk_c = tq_cap, tk_cap
    while True:
        tq = _pick_tile(Sq, tq_c)
        tk = _pick_tile(Sk, tk_c)
        if _attn_vmem_bytes(tq, tk, dkp, dvp, out_bytes) <= budget:
            return tq, tk
        if tk_c > 8:
            tk_c //= 2
        elif tq_c > 8:
            tq_c //= 2
        else:
            return tq, tk


# ---------------------------------------------------------------------------
# Public wrapper
# ---------------------------------------------------------------------------
def attention_head(query, key, value, params, *,
                   tq_cap=512, tk_cap=512, out_dtype=jnp.float32):
    """query: (B, Sq, Din), key/value: (B, Sk, Din) -> (B, Sq, Dv) in `out_dtype`.

    Weights are stored pre-transposed as (Din, Dout), biases as (1, Dout); the
    forward computes x @ W + b (== PyTorch's x @ W.T + b)."""
    wq, bq, wk, bk, wv, bv = (params["wq"], params["bq"], params["wk"],
                              params["bk"], params["wv"], params["bv"])
    B, Sq, Din = query.shape
    _, Sk, _ = key.shape
    Dk = wq.shape[1]
    Dv = wv.shape[1]

    # Fold the 1/sqrt(dk) score scale into the q projection (exactly equivalent),
    # in f32, before any bf16 cast.
    scale = 1.0 / (Dk ** 0.5)
    wq_s, bq_s = wq * scale, bq * scale

    # Zero-pad projection widths to lane-dense multiples of 128 (exact: padded
    # q/k columns are zero so they add nothing to q.k; padded v columns give
    # zero output columns that are sliced off below).
    Dkp = _round_up(max(Dk, 128), 128)
    Dvp = _round_up(max(Dv, 128), 128)
    wq_p, bq_p = _pad_cols(wq_s, Dkp), _pad_cols(bq_s, Dkp)
    wk_p, bk_p = _pad_cols(wk, Dkp), _pad_cols(bk, Dkp)
    wv_p, bv_p = _pad_cols(wv, Dvp), _pad_cols(bv, Dvp)

    # bf16 activations + weights at the call boundary; biases stay f32 (added
    # once, in f32, inside the projection kernel).
    to_bf = lambda a: a.astype(jnp.bfloat16)

    # Hoisted projections: computed once per (batch, seq-tile), never inside the
    # flash loop.
    qp = _project(to_bf(query), to_bf(wq_p), bq_p.astype(jnp.float32))
    kp = _project(to_bf(key),   to_bf(wk_p), bk_p.astype(jnp.float32))
    vp = _project(to_bf(value), to_bf(wv_p), bv_p.astype(jnp.float32))

    out_bytes = jnp.dtype(out_dtype).itemsize
    budget = 24 * 1024 * 1024          # fits v7x's 32 MiB default scoped VMEM
    tq, tk = _attention_tiles(Sq, Sk, Dkp, Dvp, out_bytes, tq_cap, tk_cap, budget)

    # Keep both v7x TensorCores busy: want >= 2 programs on the parallel axes.
    if B * (Sq // tq) < 2 and Sq % 2 == 0 and (Sq // 2) % 8 == 0:
        tq = _pick_tile(Sq, Sq // 2)

    grid = (B, Sq // tq, Sk // tk)

    out_padded = pl.pallas_call(
        _flash_attn_kernel,
        out_shape=jax.ShapeDtypeStruct((B, Sq, Dvp), out_dtype),
        grid=grid,
        in_specs=[
            pl.BlockSpec((None, tq, Dkp), lambda b, qi, ki: (b, qi, 0)),   # q (projected)
            pl.BlockSpec((None, tk, Dkp), lambda b, qi, ki: (b, ki, 0)),   # k (projected)
            pl.BlockSpec((None, tk, Dvp), lambda b, qi, ki: (b, ki, 0)),   # v (projected)
        ],
        out_specs=pl.BlockSpec((None, tq, Dvp), lambda b, qi, ki: (b, qi, 0)),
        scratch_shapes=[
            pltpu.VMEM((tq, 1), jnp.float32),     # running max
            pltpu.VMEM((tq, 1), jnp.float32),     # running denominator
            pltpu.VMEM((tq, Dvp), jnp.float32),   # output accumulator
        ],
        compiler_params=pltpu.CompilerParams(
            dimension_semantics=("parallel", "parallel", "arbitrary"),
            vmem_limit_bytes=32 * 1024 * 1024),
    )(qp, kp, vp)

    # Slice off the lane padding (plain XLA slice outside the kernel).
    return out_padded[:, :, :Dv]


# ---------------------------------------------------------------------------
# Params init + pure-JAX reference
# ---------------------------------------------------------------------------
def init_params(key, dim_in, dim_k, dim_v):
    """Deterministic init mirroring torch.nn.Linear's U(-1/sqrt(fan_in), 1/sqrt(fan_in))."""
    ks = jax.random.split(key, 6)
    bound = 1.0 / (dim_in ** 0.5)
    u = lambda k, shape: jax.random.uniform(k, shape, jnp.float32, -bound, bound)
    return {
        # stored pre-transposed: (dim_in, dim_out)
        "wq": u(ks[0], (dim_in, dim_k)),
        "bq": u(ks[1], (1, dim_k)),
        "wk": u(ks[2], (dim_in, dim_k)),
        "bk": u(ks[3], (1, dim_k)),
        "wv": u(ks[4], (dim_in, dim_v)),
        "bv": u(ks[5], (1, dim_v)),
    }


def _reference(query, key, value, params):
    """Pure-JAX f32 reference matching the PyTorch module."""
    q = query @ params["wq"] + params["bq"][0]
    k = key @ params["wk"] + params["bk"][0]
    v = value @ params["wv"] + params["bv"][0]
    scores = jnp.einsum("bqd,bkd->bqk", q, k) / (q.shape[-1] ** 0.5)
    p = jax.nn.softmax(scores, axis=-1)
    return jnp.einsum("bqk,bkd->bqd", p, v)


if __name__ == "__main__":
    B, Sq, Sk = 2, 8, 8
    dim_in, dim_k, dim_v = 32, 16, 16

    root = jax.random.PRNGKey(0)
    k_p, k_q, k_k, k_v = jax.random.split(root, 4)
    params = init_params(k_p, dim_in, dim_k, dim_v)

    query = jax.random.normal(k_q, (B, Sq, dim_in), jnp.float32)
    key = jax.random.normal(k_k, (B, Sk, dim_in), jnp.float32)
    value = jax.random.normal(k_v, (B, Sk, dim_in), jnp.float32)

    out = attention_head(query, key, value, params)
    out = jax.block_until_ready(out)

    ref = _reference(query, key, value, params)
    assert out.shape == (B, Sq, dim_v)
    # bf16 MXU operands (activations/weights/projections) => looser tolerance than pure f32.
    err = float(jnp.max(jnp.abs(out - ref)))
    assert jnp.allclose(out, ref, atol=5e-2, rtol=5e-2), f"mismatch vs reference: {err:.3e}"

    print("KERNEL_OK")
</pallas_src>

<mosaic_0001>
module attributes {stable_mosaic.version = 11 : i64} {
  func.func @_linear_kernel(%arg0: i32, %arg1: i32, %arg2: memref<1x8x32xbf16, #tpu.memory_space<vmem>>, %arg3: memref<32x128xbf16, #tpu.memory_space<vmem>>, %arg4: memref<1x128xf32, #tpu.memory_space<vmem>>, %arg5: memref<1x8x128xbf16, #tpu.memory_space<vmem>>) attributes {dimension_semantics = [#tpu.dimension_semantics<parallel>, #tpu.dimension_semantics<parallel>], iteration_bounds = array<i64: 2, 1>, scalar_prefetch = 0 : i64, scratch_operands = 0 : i64, tpu.core_type = #tpu.core_type<tc>, window_params = [{transform_indices = @transform_0, window_bounds = array<i64: 1, 8, 32>}, {pipeline_mode = #tpu.pipeline_mode<synchronous>, transform_indices = @transform_1, window_bounds = array<i64: 32, 128>}, {pipeline_mode = #tpu.pipeline_mode<synchronous>, transform_indices = @transform_2, window_bounds = array<i64: 1, 128>}, {transform_indices = @transform_3, window_bounds = array<i64: 1, 8, 128>}]} {
    %c0 = arith.constant 0 : index
    %c0_0 = arith.constant 0 : index
    %c0_1 = arith.constant 0 : index
    %0 = vector.load %arg2[%c0, %c0_0, %c0_1] : memref<1x8x32xbf16, #tpu.memory_space<vmem>>, vector<1x8x32xbf16>
    %1 = vector.shape_cast %0 : vector<1x8x32xbf16> to vector<8x32xbf16>
    %c0_2 = arith.constant 0 : index
    %c0_3 = arith.constant 0 : index
    %2 = vector.load %arg3[%c0_2, %c0_3] : memref<32x128xbf16, #tpu.memory_space<vmem>>, vector<32x128xbf16>
    %cst = arith.constant dense<0.000000e+00> : vector<8x128xf32>
    %3 = tpu.matmul %1, %2, %cst {dimension_numbers = #tpu.dot_dimension_numbers<[1], [0], [0], [1], [0, 0, 1, 1], [], []>} : vector<8x32xbf16>, vector<32x128xbf16>, vector<8x128xf32> -> vector<8x128xf32>
    %c0_4 = arith.constant 0 : index
    %c0_5 = arith.constant 0 : index
    %4 = vector.load %arg4[%c0_4, %c0_5] : memref<1x128xf32, #tpu.memory_space<vmem>>, vector<1x128xf32>
    %5 = vector.broadcast %4 : vector<1x128xf32> to vector<8x128xf32>
    %6 = arith.addf %3, %5 : vector<8x128xf32>
    %7 = arith.truncf %6 : vector<8x128xf32> to vector<8x128xbf16>
    %c0_6 = arith.constant 0 : index
    %c0_7 = arith.constant 0 : index
    %c0_8 = arith.constant 0 : index
    %8 = vector.load %arg5[%c0_6, %c0_7, %c0_8] : memref<1x8x128xbf16, #tpu.memory_space<vmem>>, vector<1x8x128xbf16>
    %9 = vector.shape_cast %8 : vector<1x8x128xbf16> to vector<8x128xbf16>
    %10 = vector.shape_cast %7 : vector<8x128xbf16> to vector<1x8x128xbf16>
    tpu.vector_store %arg5[%c0_6, %c0_7, %c0_8], %10 {strides = array<i32>} : memref<1x8x128xbf16, #tpu.memory_space<vmem>>, vector<1x8x128xbf16>,
    return
  }
  func.func @transform_0(%arg0: i32, %arg1: i32) -> (i32, i32, i32) {
    %c0_i32 = arith.constant 0 : i32
    %c0_i32_0 = arith.constant 0 : i32
    return %arg0, %arg1, %c0_i32 : i32, i32, i32
  }
  func.func @transform_1(%arg0: i32, %arg1: i32) -> (i32, i32) {
    %c0_i32 = arith.constant 0 : i32
    %c0_i32_0 = arith.constant 0 : i32
    %c0_i32_1 = arith.constant 0 : i32
    return %c0_i32, %c0_i32_0 : i32, i32
  }
  func.func @transform_2(%arg0: i32, %arg1: i32) -> (i32, i32) {
    %c0_i32 = arith.constant 0 : i32
    %c0_i32_0 = arith.constant 0 : i32
    %c0_i32_1 = arith.constant 0 : i32
    return %c0_i32, %c0_i32_0 : i32, i32
  }
  func.func @transform_3(%arg0: i32, %arg1: i32) -> (i32, i32, i32) {
    %c0_i32 = arith.constant 0 : i32
    %c0_i32_0 = arith.constant 0 : i32
    return %arg0, %arg1, %c0_i32 : i32, i32, i32
  }
}

</mosaic_0001>

<bundles_post_ra>
// kernel: tpu_custom_call.1
= control target key start
LH: loop header
LB: loop body
LE: loop exit
PB: predicated region body
PF: predicated region fallthrough
CT: control target
= control target key end

     0   :  { %8 = vsyncpa [#allocation3], 0  ;;  %s893_s0 = inlined_call_operand.hbm [shape: bf16[2,8,32], index: 0, kind: input, shape index: {}]   ;;  %s894_s1 = inlined_call_operand.hbm [shape: bf16[32,128], index: 1, kind: input, shape index: {}]   ;;  %s895_s2 = inlined_call_operand.vmem [shape: f32[1,128], index: 2, kind: input, shape index: {}]   ;;  %s896_s3 = inlined_call_operand.hbm [shape: bf16[2,8,128], index: 3, kind: output, shape index: {}]  }
   0x1   :  { %10 = vsyncpa [#allocation3 + $0x1], 0 }
   0x2   :  { %11 = vsyncpa [#allocation6], 0 }
   0x3   :  { %12 = vsyncpa [#allocation4], 0 }
   0x4   :  { %14 = vsyncpa [#allocation4 + $0x1], 0  ;;  %s676_s12 = smov 0   ;;  %s678_s13 = smov 0  }
   0x5   :  { %s680_s14 = smov 0   ;;  %s682_s15 = smov 0  }
   0x6   :  { %s684_s16 = smov 0   ;;  %s686_s17 = smov 0  }
   0x7 LB: > { %s394_s18 = sadd.s32 4294967295, %s647_s17   ;;  %s395_s19 = sadd.s32 4294967294, %s647_s17   ;;  %s647_s17 = sphi %s686_s17, %s20_s17   ;;  %s643_s16 = sphi %s684_s16, %s920_s16   ;;  %s639_s15 = sphi %s682_s15, %s919_s15   ;;  %s635_s14 = sphi %s680_s14, %s918_s14   ;;  %s631_s13 = sphi %s678_s13, %s917_s13   ;;  %s627_s12 = sphi %s676_s12, %s916_s12  }
   0x8   : > { %p54_p0 = scmp.ne.s32.totalorder %s631_s13, %s627_s12  ;;  %p710_p1 = scmp.eq.s32.totalorder %s394_s18, 0 }
   0x9   : > { %p714_p2 = scmp.eq.s32.totalorder %s394_s18, 1  ;;  %p128_p3 = scmp.eq.s32.totalorder %s395_s19, 1 }
   0xa   : > { %s901_s20 = scalar_select %p710_p1, 1, 0 }
   0xb   : > { %s902_s21 = scalar_select %p714_p2, 1, 0 }
   0xc   : > { %p720_p4 = por %p710_p1, %p54_p0  ;;  %p396_p5 = scmp.ge.s32.totalorder %s647_s17, 1 }
   0xd   : > { %p725_p6 = por %p128_p3, %p54_p0  ;;  %p135_p7 = scmp.lt.s32.totalorder %s647_s17, 3 }
   0xe   : > { %s903_s22 = scalar_select %p720_p4, 1, 0 }
   0xf   : > { %s904_s23 = scalar_select %p725_p6, 1, 0 }
  0x10   : > { %p730_p8 = pnand %p396_p5, %p135_p7  ;;  %s649_s25 = smov [#allocation5]  }
  0x11   : > { %s147_s26 = sshll.u32 %s649_s25, 4  ;;  %s32_s28 = sadd.s32 1, %s643_s16  ;;  %s148_s26 = int_to_ptr.vmem [resolvable:$true] %s147_s26 }
  0x12   : > { %s905_s24 = scalar_select %p730_p8, 1, 0 }
  0x13   : > { %p432_p9 = pneg %p730_p8  ;;  %s503_s4 = scalar_lea.hbm %s894_s1, 256 }
  0x14   : > { %p504_p12 = scmp.ne.s32.totalorder %s894_s1, %s503_s4  ;;  %p510_p5 = scmp.lt.u32.totalorder %s503_s4, %s894_s1 }
  0x15   : > { %p739_p11 = pnand %p432_p9, %p710_p1 }
  0x17   : > { %p505_p13 = pneg %p739_p11 }
  0x19   : > { %p506_p0 = pnand %p505_p13, %p504_p12 }
  0x1b   : > { %p507_p3 = pneg %p506_p0 }
  0x1d   : > { %p512_p7 = pnand %p510_p5, %p507_p3 }
  0x1f   : > { %515 = shalt.err (!%p512_p7)
}
  0x20   : > { %s516_s9 = scalar_lea.vmem %s148_s26, 256  ;;  %p524_p1 = scmp.lt.s32.totalorder %s148_s26, %s148_s26 }
  0x21   : > { %p517_p9 = scmp.ne.s32.totalorder %s148_s26, %s516_s9  ;;  %p525_p4 = scmp.lt.s32.totalorder %s516_s9, %s516_s9 }
  0x23   : > { %p519_p10 = pnand %p517_p9, %p505_p13  ;;  %p526_p8 = por %p525_p4, %p524_p1 }
  0x25   : > { %p520_p6 = pneg %p519_p10 }
  0x27   : > { %p527_p2 = pnand %p526_p8, %p520_p6 }
  0x29   : > { %530 = shalt.err (!%p527_p2)
}
  0x2a   : > { %s650_s10 = smov 64   ;;  %s651_s11 = smov 4  }
  0x2b   : > { %435 = dma.hbm_to_vmem [thread:$0]  (!%p739_p11), %s894_s1, 256, %s148_s26, [#allocation6], %s650_s10, %s650_s10, %s651_s11  }
  0x2c   : > { %p34_p1 = scmp.ge.s32.totalorder %s32_s28, 2  ;;  %s41_s25 = sadd.s32 1, %s635_s14 }
  0x2d   : > { %p48_p2 = scmp.ne.s32.totalorder %s635_s14, %s631_s13  ;;  %p49_p4 = scmp.eq.s32.totalorder %s647_s17, 0 }
  0x2e   : > { %s922_s28 = smov (%p34_p1, %s32_s28), 0  ;;  %p908_p8 = scmp.ne.s32.totalorder %s902_s21, 0 }
  0x2f   : > { %p766_p6 = por %p49_p4, %p48_p2  ;;  %s36_s27 = ssub.s32 %s643_s16, %s922_s28 }
  0x30   : > { %p772_p10 = por %p908_p8, %p48_p2  ;;  %p445_p12 = scmp.lt.s32.totalorder %s647_s17, 2 }
  0x31   : > { %p39_p11 = scmp.eq.s32.totalorder %s36_s27, 0  ;;  %s164_s26 = sand.u32 1, %s635_s14  }
  0x32   : > { %s399_s4 = sshll.u32 %s164_s26, 2  ;;  %s400_s6 = sshll.u32 %s643_s16, 6 }
  0x33   : > { %s781_s5 = scalar_select %p39_p11, %s635_s14, %s41_s25  }
  0x34   : > { %s787_s9 = scalar_lea.hbm %s893_s0, %s400_s6  ;;  %s168_s21 = scalar_lea.vmem [#allocation2], %s399_s4 }
  0x35   : > { %s176_s10 = sshll.u32 %s168_s21, 4  ;;  %p793_p13 = pnand %p445_p12, %p766_p6  ;;  %s789_s10 = int_to_ptr.vmem [resolvable:$true] %s176_s10 }
  0x36   : > { %s165_s18 = scalar_lea.sflag [#allocation3], %s164_s26  ;;  %s531_s19 = scalar_lea.hbm %s787_s9, 64 }
  0x37   : > { %p532_p0 = scmp.ne.s32.totalorder %s787_s9, %s531_s19  ;;  %p533_p3 = pneg %p793_p13 }
  0x38   : > { %s536_s4 = scalar_lea.hbm %s893_s0, 128  ;;  %p537_p9 = scmp.lt.u32.totalorder %s787_s9, %s893_s0 }
  0x39   : > { %p534_p5 = pnand %p533_p3, %p532_p0  ;;  %p538_p1 = scmp.lt.u32.totalorder %s536_s4, %s531_s19 }
  0x3a   : > { %p540_p4 = scmp.lt.u32.totalorder %s531_s19, %s787_s9 }
  0x3b   : > { %p535_p7 = pneg %p534_p5  ;;  %p539_p2 = por %p538_p1, %p537_p9 }
  0x3d   : > { %p541_p6 = por %p540_p4, %p539_p2 }
  0x3f   : > { %p542_p8 = pnand %p541_p6, %p535_p7 }
  0x41   : > { %545 = shalt.err (!%p542_p8)
}
  0x42   : > { %s546_s26 = scalar_lea.vmem %s789_s10, 64  ;;  %s652_s7 = smov [#allocation2]  }
  0x43   : > { %p547_p12 = scmp.ne.s32.totalorder %s789_s10, %s546_s26  ;;  %s551_s8 = sshll.u32 %s652_s7, 4  ;;  %s552_s8 = int_to_ptr.vmem [resolvable:$false] %s551_s8 }
  0x44   : > { %s553_s21 = scalar_lea.vmem %s552_s8, 128  ;;  %p554_p5 = scmp.lt.s32.totalorder %s789_s10, %s552_s8 }
  0x45   : > { %p549_p11 = pnand %p547_p12, %p533_p3  ;;  %p555_p9 = scmp.lt.s32.totalorder %s553_s21, %s546_s26 }
  0x47   : > { %p550_p0 = pneg %p549_p11  ;;  %p556_p1 = por %p555_p9, %p554_p5 }
  0x49   : > { %p557_p2 = pnand %p556_p1, %p550_p0 }
  0x4b   : > { %560 = shalt.err (!%p557_p2)
}
  0x4c   : > { %439 = dma.hbm_to_vmem [thread:$0]  (!%p793_p13), %s787_s9, 64, %s789_s10, %s165_s18  }
  0x4d   : > { %p911_p7 = scmp.ne.s32.totalorder %s905_s24, 0 }
  0x4e   : > { %s825_s19 = sand.u32 (!%p911_p7), 1, %s631_s13   ;;  %p912_p3 = scmp.ne.s32.totalorder (!%p911_p7), %s903_s22, 0 }
  0x4f   : > { %185 = sbr.rel (%p911_p7) target bundleno = 329 (0x149), region = 32  ;;  %s402_s25 = sshll.u32 (!%p911_p7), %s825_s19, 2 }
  0x50   : > { %s188_s27 = scalar_lea.sflag (!%p911_p7), [#allocation3], %s825_s19  ;;  %s191_s4 = scalar_lea.vmem (!%p911_p7), [#allocation2], %s402_s25 }
  0x56   : > { %614 = dma.done.wait (%p912_p3), %s188_s27, 64  }
  0x57   : > { %616 = vsyncadd (%p912_p3), %s188_s27, 4294967232  ;;  %p913_p4 = scmp.ne.s32.totalorder %s901_s20, 0 }
  0x59   : > { %618 = dma.done.wait (%p913_p4), [#allocation6], 256  }
  0x5a   : > { %620 = vsyncadd (%p913_p4), [#allocation6], 4294967040  ;;  %v653_v0 = vmov 0.0   ;;  %vm654_vm0 = vmmov 0   ;;  %v501_v1 = vld [vmem:[#allocation5] sm:$0xff]   ;;  %v502_v2 = vld [vmem:[#allocation5 + $0x8] sm:$0xff]  }
  0x5b   : > { %416 = vmatprep.subr.bf16.mxu0 %v653_v0  ;;  %420 = vmatprep.mubr.msk.bf16.mxu0 %vm654_vm0, %v653_v0  ;;  %v219_v3 = vld [vmem:[%s191_s4] sm:$0xf]  ;;  %vm243_vm1 = vcmask 261120   ;;  %s410_s20 = sshll.u32 %s639_s15, 6  ;;  %s217_s9 = scalar_lea.vmem [#allocation7], %s402_s25 }
  0x5c   : > { %417 = vmatpush3.bf16.msra.mxu0 %v501_v1  ;;  %v405_v4 = vld [vmem:[%s895_s2] ss:$0 sm:$0xff]  ;;  %s304_s10 = sshll.u32 %s217_s9, 4  ;;  %s844_s29 = scalar_lea.hbm %s896_s3, %s410_s20  ;;  %s846_s10 = int_to_ptr.vmem [resolvable:$true] %s304_s10 }
  0x5d   : > { %418 = vmatprep.subr.bf16.mxu0 %v653_v0  ;;  %s290_s6 = scalar_lea.sflag [#allocation4], %s825_s19  ;;  %s561_s15 = scalar_lea.vmem %s846_s10, 64 }
  0x5e   : > { %p562_p13 = scmp.ne.s32.totalorder %s846_s10, %s561_s15  ;;  %s655_s26 = smov [#allocation7]  }
  0x5f   : > { %s565_s7 = sshll.u32 %s655_s26, 4  ;;  %s566_s7 = int_to_ptr.vmem [resolvable:$false] %s565_s7 }
  0x60   : > { %419 = vmatpush3.bf16.msra.mxu0 %v502_v2  ;;  %p563_p6 = pnand %p562_p13, %p772_p10  ;;  %s567_s8 = scalar_lea.vmem %s566_s7, 128 }
  0x61   : > { %p568_p12 = scmp.lt.s32.totalorder %s846_s10, %s566_s7  ;;  %p569_p11 = scmp.lt.s32.totalorder %s567_s8, %s561_s15 }
  0x62   : > { %p564_p8 = pneg %p563_p6 }
  0x63   : > { %421 = vmatmul.mubr.msk.bf16.vlgmr.msra.gmra.mrb[0].mxu0 %vm243_vm1, %v219_v3  ;;  %p570_p0 = por %p569_p11, %p568_p12 }
  0x65   : > { %p571_p5 = pnand %p570_p0, %p564_p8 }
 0x136   : > { %v281_v5 = vpop.f32.mrb[0].mxu0 }
 0x137   : > { %v282_v6 = vadd.f32 %v405_v4, %v281_v5  ;;  %v422_v7 = vpop.f32.mrb[1].mxu0 }
 0x138   : > { %v284_v8 = vpop.f32.mrb[2].mxu0 }
 0x139   : > { %v287_v9 = vpack.c.bf16 %v282_v6, %v282_v6  ;;  %v423_v10 = vpop.f32.mrb[3].mxu0 }
 0x13b   : > { %288 = vst [vmem:[%s217_s9] sm:$0xf] %v287_v9 }
 0x13c   : > { %574 = shalt.err (!%p571_p5)
}
 0x13d   : > { %s575_s21 = scalar_lea.hbm %s844_s29, 64  ;;  %s579_s27 = scalar_lea.hbm %s896_s3, 128 }
 0x13e   : > { %p576_p9 = scmp.ne.s32.totalorder %s844_s29, %s575_s21  ;;  %p580_p7 = scmp.lt.u32.totalorder %s844_s29, %s896_s3 }
 0x13f   : > { %p581_p3 = scmp.lt.u32.totalorder %s579_s27, %s575_s21  ;;  %p583_p13 = scmp.lt.u32.totalorder %s575_s21, %s844_s29 }
 0x140   : > { %p577_p1 = pnand %p576_p9, %p772_p10 }
 0x141   : > { %p582_p4 = por %p581_p3, %p580_p7 }
 0x142   : > { %p578_p2 = pneg %p577_p1 }
 0x143   : > { %p584_p6 = por %p583_p13, %p582_p4 }
 0x145   : > { %p585_p8 = pnand %p584_p6, %p578_p2 }
 0x147   : > { %588 = shalt.err (!%p585_p8)
}
 0x148   : > { %430 = dma.vmem_to_hbm [thread:$0]  (%p772_p10), %s846_s10, 64, %s844_s29, %s290_s6  }
 0x149 PF: > { %s316_s24 = sand.u32 1, %s627_s12   ;;  %p914_p12 = scmp.ne.s32.totalorder %s904_s23, 0 }
 0x14a   : > { %p915_p11 = scmp.ge.s32.totalorder %s647_s17, 2  ;;  %s317_s20 = scalar_lea.sflag [#allocation4], %s316_s24 }
 0x14c   : > { %p441_p0 = pnand %p915_p11, %p914_p12 }
 0x14e   : > { %622 = dma.done.wait (!%p441_p0), %s317_s20, 64  }
 0x14f   : > { %624 = vsyncadd (!%p441_p0), %s317_s20, 4294967232  ;;  %s20_s17 = sadd.s32 1, %s647_s17   ;;  %s916_s12 = smov %s631_s13 }
 0x150   : > { %p17_p5 = scmp.ge.s32.totalorder %s20_s17, 4   ;;  %s917_s13 = smov %s635_s14 }
 0x151   : > { %s918_s14 = smov %s781_s5  ;;  %s919_s15 = smov %s643_s16 }
 0x152   : > { %s920_s16 = smov %s922_s28  ;;  %19 = sbr.rel (!%p17_p5) target bundleno = 7 (0x7), region = 81 }
 0x159   :  { %322 = vsyncpa [#allocation3], 1 }
 0x15a   :  { %324 = vsyncpa [#allocation3 + $0x1], 1 }
 0x15b   :  { %325 = vsyncpa [#allocation6], 1 }
 0x15c   :  { %326 = vsyncpa [#allocation4], 1 }
 0x15d   :  { %328 = vsyncpa [#allocation4 + $0x1], 1 }

</bundles_post_ra>
